<compile_context>
chip_gen: v6e
topology: v6e:2x2x1
jax: 0.10.0
libtpu: 0.0.40
codegen_flags: <defaults>
</compile_context>

<pallas_src>
import functools

import jax
import jax.numpy as jnp
from jax import lax
from jax.experimental import pallas as pl
from jax.experimental.pallas import tpu as pltpu


def _l2_normalize(x, eps=1e-12):
    # F.normalize(x, p=2, dim=1, eps): x / max(||x||, eps) == x * rsqrt(max(sumsq, eps^2))
    sumsq = jnp.sum(x * x, axis=1, keepdims=True)
    return x * lax.rsqrt(jnp.maximum(sumsq, eps * eps))


# Contract dim 1 of both operands: A @ B.T without materializing B.T.
_DN = (((1,), (1,)), ((), ()))


def _make_kernel(temperature, threshold):
    inv_t = 1.0 / float(temperature)
    threshold = float(threshold)

    def kernel(imgs_ref, texts_q_ref, texts_k_ref, out_ref, acc_ref):
        if threshold <= 0.0:
            # (T·Tᵀ + 1)/2 ∈ [0, 1]  ⇒  relu(threshold - ·) ≡ 0
            # ⇒ denominator == nominator ⇒ log-ratio ≡ 0 exactly.
            out_ref[...] = jnp.zeros_like(out_ref)
            return

        k = pl.program_id(1)

        im = imgs_ref[...].astype(jnp.float32)      # (TM, D) image rows
        tq = texts_q_ref[...].astype(jnp.float32)   # (TM, D) text rows (same row block)
        tk = texts_k_ref[...].astype(jnp.float32)   # (TK, D) text key block

        i_n = _l2_normalize(im)
        tq_n = _l2_normalize(tq)
        tk_n = _l2_normalize(tk)
        # theta=False: mlp_* are Identity; the second F.normalize of already
        # unit-norm rows is an identity up to eps and is elided.

        @pl.when(k == 0)
        def _():
            acc_ref[...] = jnp.zeros_like(acc_ref)

        # s_it[i, j] = img_i · text_j ; s_tt[i, j] = text_i · text_j  (MXU, no .T)
        s_it = lax.dot_general(i_n, tk_n, _DN, preferred_element_type=jnp.float32)
        s_tt = lax.dot_general(tq_n, tk_n, _DN, preferred_element_type=jnp.float32)

        tt = jnp.maximum(threshold - (s_tt + 1.0) * 0.5, 0.0)
        acc_ref[...] += jnp.sum(jnp.exp(s_it * inv_t) * tt, axis=1, keepdims=True)

        @pl.when(k == pl.num_programs(1) - 1)
        def _():
            # Diagonal of img_to_text as a row-wise dot; log(nom/den) in log domain.
            s_ii = jnp.sum(i_n * tq_n, axis=1, keepdims=True)
            den = acc_ref[...] + jnp.exp(s_ii * inv_t)
            out_ref[...] = s_ii * inv_t - jnp.log(den)

    return kernel


def _pick_tile(n, pref):
    """Largest tile <= pref that divides n and satisfies the (8,·) sublane rule."""
    if n <= pref:
        return n
    if n % pref == 0:
        return pref
    for t in range(pref, 7, -8):
        if n % t == 0:
            return t
    return n


@functools.partial(jax.jit, static_argnames=("temperature", "threshold"))
def intro_alignment_loss(train_texts, train_imgs, labels, instances=None,
                         temperature=1.0, threshold=0.0):
    """Forward of Intro_alignment_loss_Variant (theta=False). Returns (loss, mask.sum())."""
    del instances  # unused by the reference forward
    n, d = train_texts.shape

    tm = _pick_tile(n, 256)                               # row (query) block — "parallel"
    tk = _pick_tile(n, 512)                               # key block — "arbitrary"
    grid = (n // tm, (n // tk) if threshold > 0.0 else 1)

    log_ratio = pl.pallas_call(
        _make_kernel(temperature, threshold),
        out_shape=jax.ShapeDtypeStruct((n, 1), jnp.float32),
        grid_spec=pltpu.PrefetchScalarGridSpec(
            num_scalar_prefetch=0,
            grid=grid,
            in_specs=[
                pl.BlockSpec((tm, d), lambda i, k: (i, 0)),   # image row block
                pl.BlockSpec((tm, d), lambda i, k: (i, 0)),   # text row block (diag / tt rows)
                pl.BlockSpec((tk, d), lambda i, k: (k, 0)),   # text key block
            ],
            out_specs=pl.BlockSpec((tm, 1), lambda i, k: (i, 0)),
            scratch_shapes=[pltpu.VMEM((tm, 1), jnp.float32)],
        ),
        compiler_params=pltpu.CompilerParams(
            dimension_semantics=("parallel", "arbitrary")),
    )(train_imgs, train_texts, train_texts)

    # Tiny O(N) epilogue kept in XLA; labels never enter a lane-width-1 VMEM tile.
    mask = 1.0 - labels.astype(jnp.float32)
    msum = jnp.sum(mask)
    loss = -jnp.sum(log_ratio[:, 0] * mask) / msum
    return loss, msum


# ---------------------------------------------------------------------------
# Pure-JAX reference (faithful transcription of the PyTorch forward).
# ---------------------------------------------------------------------------
def _normalize_ref(x, eps=1e-12):
    norm = jnp.sqrt(jnp.sum(x * x, axis=1, keepdims=True))
    return x / jnp.maximum(norm, eps)


def _reference(train_texts, train_imgs, labels, temperature=1.0, threshold=0.0):
    t = _normalize_ref(train_texts.astype(jnp.float32))
    im = _normalize_ref(train_imgs.astype(jnp.float32))
    tt = jnp.maximum(threshold - (t @ t.T + 1.0) / 2.0, 0.0)
    t2 = _normalize_ref(t)        # mlp_text = Identity
    i2 = _normalize_ref(im)       # mlp_img = Identity
    it = jnp.exp((i2 @ t2.T) / temperature)
    nom = jnp.diagonal(it)
    den = jnp.sum(it * tt, axis=1) + nom
    mask = 1.0 - labels.astype(jnp.float32)
    msum = jnp.sum(mask)
    loss = -jnp.sum(jnp.log(nom / den) * mask) / msum
    return loss, msum


if __name__ == "__main__":
    N, D = 8, 128  # small batch; lane-dense feature dim (multiple of 128)

    key = jax.random.PRNGKey(0)
    k_t, k_i, k_l = jax.random.split(key, 3)
    train_texts = jax.random.normal(k_t, (N, D), dtype=jnp.float32)
    train_imgs = jax.random.normal(k_i, (N, D), dtype=jnp.float32)
    labels = (jax.random.uniform(k_l, (N,)) > 0.5).astype(jnp.float32)
    labels = labels.at[0].set(0.0)   # guarantee mask.sum() > 0 (avoid div-by-zero)
    instances = jnp.arange(N)        # unused by forward, kept for signature parity

    # threshold > 0 exercises the full tt/denominator path; threshold = 0 is the
    # module default (trace-time short-circuit, loss is exactly 0).
    for thr in (0.75, 0.0):
        loss, mask_sum = intro_alignment_loss(
            train_texts, train_imgs, labels, instances,
            temperature=1.0, threshold=thr)
        jax.block_until_ready((loss, mask_sum))

        ref_loss, ref_msum = _reference(train_texts, train_imgs, labels,
                                        temperature=1.0, threshold=thr)
        assert jnp.allclose(loss, ref_loss, atol=1e-5, rtol=1e-5), (thr, loss, ref_loss)
        assert jnp.allclose(mask_sum, ref_msum), (thr, mask_sum, ref_msum)

    print("KERNEL_OK")
</pallas_src>

<mosaic_0001>
module attributes {stable_mosaic.version = 11 : i64} {
  func.func @kernel(%arg0: i32, %arg1: i32, %arg2: memref<8x128xf32, #tpu.memory_space<vmem>>, %arg3: memref<8x128xf32, #tpu.memory_space<vmem>>, %arg4: memref<8x128xf32, #tpu.memory_space<vmem>>, %arg5: memref<8x1xf32, #tpu.memory_space<vmem>>, %arg6: memref<8x1xf32, #tpu.memory_space<vmem>>) attributes {dimension_semantics = [#tpu.dimension_semantics<parallel>, #tpu.dimension_semantics<arbitrary>], iteration_bounds = array<i64: 1, 1>, scalar_prefetch = 0 : i64, scratch_operands = 1 : i64, tpu.core_type = #tpu.core_type<tc>, window_params = [{transform_indices = @transform_0, window_bounds = array<i64: 8, 128>}, {transform_indices = @transform_1, window_bounds = array<i64: 8, 128>}, {transform_indices = @transform_2, window_bounds = array<i64: 8, 128>}, {transform_indices = @transform_3, window_bounds = array<i64: 8, 1>}]} {
    %c0 = arith.constant 0 : index
    %c0_0 = arith.constant 0 : index
    %0 = vector.load %arg2[%c0, %c0_0] : memref<8x128xf32, #tpu.memory_space<vmem>>, vector<8x128xf32>
    %c0_1 = arith.constant 0 : index
    %c0_2 = arith.constant 0 : index
    %1 = vector.load %arg3[%c0_1, %c0_2] : memref<8x128xf32, #tpu.memory_space<vmem>>, vector<8x128xf32>
    %c0_3 = arith.constant 0 : index
    %c0_4 = arith.constant 0 : index
    %2 = vector.load %arg4[%c0_3, %c0_4] : memref<8x128xf32, #tpu.memory_space<vmem>>, vector<8x128xf32>
    %3 = arith.mulf %0, %0 : vector<8x128xf32>
    %cst = arith.constant dense<0.000000e+00> : vector<8xf32>
    %4 = vector.multi_reduction <add>, %3, %cst [1] : vector<8x128xf32> to vector<8xf32>
    %5 = vector.shape_cast %4 : vector<8xf32> to vector<8x1xf32>
    %cst_5 = arith.constant 1.000000e-24 : f32
    %6 = vector.broadcast %cst_5 : f32 to vector<8x1xf32>
    %7 = arith.maximumf %5, %6 : vector<8x1xf32>
    %8 = math.rsqrt %7 : vector<8x1xf32>
    %9 = vector.broadcast %8 : vector<8x1xf32> to vector<8x128xf32>
    %10 = arith.mulf %0, %9 : vector<8x128xf32>
    %11 = arith.mulf %1, %1 : vector<8x128xf32>
    %cst_6 = arith.constant dense<0.000000e+00> : vector<8xf32>
    %12 = vector.multi_reduction <add>, %11, %cst_6 [1] : vector<8x128xf32> to vector<8xf32>
    %13 = vector.shape_cast %12 : vector<8xf32> to vector<8x1xf32>
    %cst_7 = arith.constant 1.000000e-24 : f32
    %14 = vector.broadcast %cst_7 : f32 to vector<8x1xf32>
    %15 = arith.maximumf %13, %14 : vector<8x1xf32>
    %16 = math.rsqrt %15 : vector<8x1xf32>
    %17 = vector.broadcast %16 : vector<8x1xf32> to vector<8x128xf32>
    %18 = arith.mulf %1, %17 : vector<8x128xf32>
    %19 = arith.mulf %2, %2 : vector<8x128xf32>
    %cst_8 = arith.constant dense<0.000000e+00> : vector<8xf32>
    %20 = vector.multi_reduction <add>, %19, %cst_8 [1] : vector<8x128xf32> to vector<8xf32>
    %21 = vector.shape_cast %20 : vector<8xf32> to vector<8x1xf32>
    %cst_9 = arith.constant 1.000000e-24 : f32
    %22 = vector.broadcast %cst_9 : f32 to vector<8x1xf32>
    %23 = arith.maximumf %21, %22 : vector<8x1xf32>
    %24 = math.rsqrt %23 : vector<8x1xf32>
    %25 = vector.broadcast %24 : vector<8x1xf32> to vector<8x128xf32>
    %26 = arith.mulf %2, %25 : vector<8x128xf32>
    %c0_i32 = arith.constant 0 : i32
    %27 = arith.cmpi eq, %arg1, %c0_i32 : i32
    %28 = arith.extui %27 : i1 to i32
    %c0_i32_10 = arith.constant 0 : i32
    %29 = arith.cmpi ne, %28, %c0_i32_10 : i32
    scf.if %29 {
      %cst_25 = arith.constant 0.000000e+00 : f32
      %52 = vector.broadcast %cst_25 : f32 to vector<8x1xf32>
      %c0_26 = arith.constant 0 : index
      %c0_27 = arith.constant 0 : index
      %53 = vector.load %arg6[%c0_26, %c0_27] : memref<8x1xf32, #tpu.memory_space<vmem>>, vector<8x1xf32>
      tpu.vector_store %arg6[%c0_26, %c0_27], %52 {strides = array<i32>} : memref<8x1xf32, #tpu.memory_space<vmem>>, vector<8x1xf32>,
    } else {
    }
    %cst_11 = arith.constant dense<0.000000e+00> : vector<8x8xf32>
    %30 = tpu.matmul %10, %26, %cst_11 {dimension_numbers = #tpu.dot_dimension_numbers<[1], [1], [0], [0], [0, 0, 1, 0], [], []>} : vector<8x128xf32>, vector<8x128xf32>, vector<8x8xf32> -> vector<8x8xf32>
    %cst_12 = arith.constant dense<0.000000e+00> : vector<8x8xf32>
    %31 = tpu.matmul %18, %26, %cst_12 {dimension_numbers = #tpu.dot_dimension_numbers<[1], [1], [0], [0], [0, 0, 1, 0], [], []>} : vector<8x128xf32>, vector<8x128xf32>, vector<8x8xf32> -> vector<8x8xf32>
    %cst_13 = arith.constant 1.000000e+00 : f32
    %32 = vector.broadcast %cst_13 : f32 to vector<8x8xf32>
    %33 = arith.addf %31, %32 : vector<8x8xf32>
    %cst_14 = arith.constant 5.000000e-01 : f32
    %34 = vector.broadcast %cst_14 : f32 to vector<8x8xf32>
    %35 = arith.mulf %33, %34 : vector<8x8xf32>
    %cst_15 = arith.constant 7.500000e-01 : f32
    %36 = vector.broadcast %cst_15 : f32 to vector<8x8xf32>
    %37 = arith.subf %36, %35 : vector<8x8xf32>
    %cst_16 = arith.constant 0.000000e+00 : f32
    %38 = vector.broadcast %cst_16 : f32 to vector<8x8xf32>
    %39 = arith.maximumf %37, %38 : vector<8x8xf32>
    %c0_17 = arith.constant 0 : index
    %c0_18 = arith.constant 0 : index
    %40 = vector.load %arg6[%c0_17, %c0_18] : memref<8x1xf32, #tpu.memory_space<vmem>>, vector<8x1xf32>
    %cst_19 = arith.constant 1.000000e+00 : f32
    %41 = vector.broadcast %cst_19 : f32 to vector<8x8xf32>
    %42 = arith.mulf %30, %41 : vector<8x8xf32>
    %43 = math.exp %42 : vector<8x8xf32>
    %44 = arith.mulf %43, %39 : vector<8x8xf32>
    %cst_20 = arith.constant dense<0.000000e+00> : vector<8xf32>
    %45 = vector.multi_reduction <add>, %44, %cst_20 [1] : vector<8x8xf32> to vector<8xf32>
    %46 = vector.shape_cast %45 : vector<8xf32> to vector<8x1xf32>
    %47 = arith.addf %40, %46 : vector<8x1xf32>
    %c0_21 = arith.constant 0 : index
    %c0_22 = arith.constant 0 : index
    %48 = vector.load %arg6[%c0_21, %c0_22] : memref<8x1xf32, #tpu.memory_space<vmem>>, vector<8x1xf32>
    tpu.vector_store %arg6[%c0_21, %c0_22], %47 {strides = array<i32>} : memref<8x1xf32, #tpu.memory_space<vmem>>, vector<8x1xf32>,
    %c0_i32_23 = arith.constant 0 : i32
    %49 = arith.cmpi eq, %arg1, %c0_i32_23 : i32
    %50 = arith.extui %49 : i1 to i32
    %c0_i32_24 = arith.constant 0 : i32
    %51 = arith.cmpi ne, %50, %c0_i32_24 : i32
    scf.if %51 {
      %52 = arith.mulf %10, %18 : vector<8x128xf32>
      %cst_25 = arith.constant dense<0.000000e+00> : vector<8xf32>
      %53 = vector.multi_reduction <add>, %52, %cst_25 [1] : vector<8x128xf32> to vector<8xf32>
      %54 = vector.shape_cast %53 : vector<8xf32> to vector<8x1xf32>
      %c0_26 = arith.constant 0 : index
      %c0_27 = arith.constant 0 : index
      %55 = vector.load %arg6[%c0_26, %c0_27] : memref<8x1xf32, #tpu.memory_space<vmem>>, vector<8x1xf32>
      %cst_28 = arith.constant 1.000000e+00 : f32
      %56 = vector.broadcast %cst_28 : f32 to vector<8x1xf32>
      %57 = arith.mulf %54, %56 : vector<8x1xf32>
      %58 = math.exp %57 : vector<8x1xf32>
      %59 = arith.addf %55, %58 : vector<8x1xf32>
      %cst_29 = arith.constant 1.000000e+00 : f32
      %60 = vector.broadcast %cst_29 : f32 to vector<8x1xf32>
      %61 = arith.mulf %54, %60 : vector<8x1xf32>
      %62 = math.log %59 : vector<8x1xf32>
      %63 = arith.subf %61, %62 : vector<8x1xf32>
      %c0_30 = arith.constant 0 : index
      %c0_31 = arith.constant 0 : index
      %64 = vector.load %arg5[%c0_30, %c0_31] : memref<8x1xf32, #tpu.memory_space<vmem>>, vector<8x1xf32>
      tpu.vector_store %arg5[%c0_30, %c0_31], %63 {strides = array<i32>} : memref<8x1xf32, #tpu.memory_space<vmem>>, vector<8x1xf32>,
    } else {
    }
    return
  }
  func.func @transform_0(%arg0: i32, %arg1: i32) -> (i32, i32) {
    %c0_i32 = arith.constant 0 : i32
    %c0_i32_0 = arith.constant 0 : i32
    return %arg0, %c0_i32 : i32, i32
  }
  func.func @transform_1(%arg0: i32, %arg1: i32) -> (i32, i32) {
    %c0_i32 = arith.constant 0 : i32
    %c0_i32_0 = arith.constant 0 : i32
    return %arg0, %c0_i32 : i32, i32
  }
  func.func @transform_2(%arg0: i32, %arg1: i32) -> (i32, i32) {
    %c0_i32 = arith.constant 0 : i32
    %c0_i32_0 = arith.constant 0 : i32
    return %arg1, %c0_i32 : i32, i32
  }
  func.func @transform_3(%arg0: i32, %arg1: i32) -> (i32, i32) {
    %c0_i32 = arith.constant 0 : i32
    %c0_i32_0 = arith.constant 0 : i32
    return %arg0, %c0_i32 : i32, i32
  }
}

</mosaic_0001>

<bundles_post_ra>
// kernel: intro_alignment_loss.1
= control target key start
LH: loop header
LB: loop body
LE: loop exit
PB: predicated region body
PF: predicated region fallthrough
CT: control target
= control target key end

     0   :  { %8 = vsyncpa [#allocation4], 0  ;;  %s385_s0 = inlined_call_operand.hbm [shape: f32[8,128], index: 0, kind: input, shape index: {}]   ;;  %s386_s1 = inlined_call_operand.hbm [shape: f32[8,128], index: 1, kind: input, shape index: {}, may-alias: {1,2}]   ;;  %s387_s2 = inlined_call_operand.hbm [shape: f32[8,128], index: 2, kind: input, shape index: {}, may-alias: {1,2}]   ;;  %s388_s3 = inlined_call_operand.vmem [shape: f32[8,1], index: 3, kind: output, shape index: {}]  }
   0x1   :  { %9 = vsyncpa [#allocation6], 0  ;;  %s345_s12 = smov [#allocation5]   ;;  %s346_s14 = smov [#allocation3]  }
   0x2   :  { %s26_s13 = sshll.u32 %s345_s12, 4  ;;  %s16_s15 = sshll.u32 %s346_s14, 4  ;;  %s27_s13 = int_to_ptr.vmem [resolvable:$true] %s26_s13  ;;  %s17_s15 = int_to_ptr.vmem [resolvable:$true] %s16_s15 }
   0x3   :  { %s289_s16 = scalar_lea.vmem %s27_s13, 128  ;;  %p294_p1 = scmp.lt.s32.totalorder %s27_s13, %s27_s13 }
   0x4   :  { %p290_p0 = scmp.ne.s32.totalorder %s27_s13, %s289_s16  ;;  %p295_p2 = scmp.lt.s32.totalorder %s289_s16, %s289_s16 }
   0x6   :  { %p296_p3 = por %p295_p2, %p294_p1 }
   0x8   :  { %p297_p4 = pnand %p296_p3, %p290_p0 }
   0xa   :  { %300 = shalt.err (!%p297_p4)
}
   0xb   :  { %29 = dma.hbm_to_vmem [thread:$0]  %s386_s1, 128, %s27_s13, [#allocation6]  }
   0xc   :  { %s309_s19 = scalar_lea.vmem %s17_s15, 128  ;;  %p314_p6 = scmp.lt.s32.totalorder %s17_s15, %s17_s15 }
   0xd   :  { %p310_p5 = scmp.ne.s32.totalorder %s17_s15, %s309_s19  ;;  %p315_p7 = scmp.lt.s32.totalorder %s309_s19, %s309_s19 }
   0xf   :  { %p316_p8 = por %p315_p7, %p314_p6 }
  0x11   :  { %p317_p9 = pnand %p316_p8, %p310_p5 }
  0x13   :  { %320 = shalt.err (!%p317_p9)
}
  0x14   :  { %19 = dma.hbm_to_vmem [thread:$0]  %s385_s0, 128, %s17_s15, [#allocation4]  }
  0x15   :  { %s347_s22 = smov [#allocation7]  }
  0x16   :  { %s36_s23 = sshll.u32 %s347_s22, 4  ;;  %s37_s23 = int_to_ptr.vmem [resolvable:$true] %s36_s23 }
  0x17   :  { %s329_s24 = scalar_lea.vmem %s37_s23, 128  ;;  %p334_p11 = scmp.lt.s32.totalorder %s37_s23, %s37_s23 }
  0x18   :  { %p330_p10 = scmp.ne.s32.totalorder %s37_s23, %s329_s24  ;;  %p335_p12 = scmp.lt.s32.totalorder %s329_s24, %s329_s24 }
  0x1a   :  { %p336_p13 = por %p335_p12, %p334_p11 }
  0x1c   :  { %p337_p0 = pnand %p336_p13, %p330_p10 }
  0x1e   :  { %340 = shalt.err (!%p337_p0)
}
  0x1f   :  { %39 = dma.hbm_to_vmem [thread:$0]  %s387_s2, 128, %s37_s23, [#allocation6]  }
  0x20   :  { %341 = dma.done.wait [#allocation4], 128  }
  0x21   :  { %342 = vsyncadd [#allocation4], 4294967168 }
  0x22   :  { %343 = dma.done.wait [#allocation6], 256  }
  0x23   :  { %344 = vsyncadd [#allocation6], 4294967040  ;;  %v51_v0 = vld [vmem:[#allocation7] sm:$0xff]  ;;  %v50_v1 = vld [vmem:[#allocation5] sm:$0xff]  ;;  %vm74_vm0 = vcmask 7168   ;;  %v348_v6 = vmov 0.0  }
  0x24   :  { %v49_v2 = vld [vmem:[#allocation3] sm:$0xff]  ;;  %v64_v3 = vmul.f32 %v51_v0, %v51_v0  ;;  %v58_v4 = vmul.f32 %v50_v1, %v50_v1  ;;  %75 = vst.msk [vmem:[#allocation2] sm:$0xff] %vm74_vm0, %v348_v6  ;;  %254 = vmatprep.subr.mxu0 %v348_v6  ;;  %259 = vmatprep.subr.mxu1 %v348_v6  ;;  %vm349_vm1 = vmmov 0   ;;  %vm223_vm2 = vcmask 64512  }
  0x25   :  { %v52_v5 = vmul.f32 %v49_v2, %v49_v2  ;;  %256 = vmatprep.mubr.msk.f32.mxu0 %vm349_vm1, %v348_v6  ;;  %261 = vmatprep.mubr.msk.f32.mxu1 %vm349_vm1, %v348_v6 }
  0x26   :  { %65 = vadd.xlane.f32.xlu0 %v64_v3  ;;  %59 = vadd.xlane.f32.xlu1 %v58_v4 }
  0x2a   :  { %53 = vadd.xlane.f32.xlu0 %v52_v5 }
  0x2b   :  { %v219_v34 = vld [vmem:[#allocation2] sm:$0xff] }
  0xaf   :  { %v66_v7 = vpop.xlane.xlu0 %65  ;;  %v60_v8 = vpop.xlane.xlu1 %59 }
  0xb0   :  { %v67_v9 = vmax.f32 %v66_v7, 1e-24  ;;  %v61_v10 = vmax.f32 %v60_v8, 1e-24 }
  0xb2   :  { %269 = vrsqrt.f32 %v67_v9 }
  0xb3   :  { %271 = vrsqrt.f32 %v61_v10  ;;  %v54_v11 = vpop.xlane.xlu0 %53 }
  0xb4   :  { %v55_v12 = vmax.f32 %v54_v11, 1e-24 }
  0xb6   :  { %273 = vrsqrt.f32 %v55_v12 }
  0xbf   :  { %v270_v13 = vpop.eup %269 }
  0xc0   :  { %v272_v14 = vpop.eup %271  ;;  %v69_v15 = vmul.f32 %v270_v13, %v51_v0 }
  0xc1   :  { %v63_v16 = vmul.f32 %v272_v14, %v50_v1 }
  0xc2   :  { %255 = vmatpush3.xpose.msra.mxu0 %v69_v15  ;;  %260 = vmatpush3.xpose.msra.mxu1 %v69_v15 }
  0xc3   :  { %v274_v17 = vpop.eup %273 }
  0xc4   :  { %v57_v18 = vmul.f32 %v274_v17, %v49_v2 }
  0xc5   :  { %262 = vmatmul.mubr.f32.vlgmr.msra.gmra.mxu1 %v63_v16 }
  0xc6   :  { %257 = vmatmul.mubr.f32.vlgmr.msra.gmra.mxu0 %v57_v18  ;;  %v233_v19 = vmul.f32 %v63_v16, %v57_v18 }
  0xc8   :  { %234 = vadd.xlane.f32.xlu1 %v233_v19 }
 0x151   :  { %v235_v32 = vpop.xlane.xlu1 %234 }
 0x152   :  { %v237_v33 = vmul.f32 1.442695, %v235_v32 }
 0x185   :  { %v212_v20 = vpop.f32.mrf.mxu1 }
 0x186   :  { %v142_v21 = vpop.f32.mrf.mxu0  ;;  %v213_v23 = vadd.f32 1.0, %v212_v20 }
 0x187   :  { %v220_v22 = vmul.f32 1.442695, %v142_v21  ;;  %v263_v24 = vpop.f32.mrf.mxu1 }
 0x188   :  { %v258_v25 = vpop.f32.mrf.mxu0  ;;  %v216_v26 = vmul.f32 0.5, %v213_v23 }
 0x189   :  { %275 = vpow2.f32 %v220_v22 }
 0x18a   :  { %v217_v27 = vsub.f32 0.75, %v216_v26  ;;  %277 = vpow2.f32 %v237_v33 }
 0x18c   :  { %v218_v28 = vmax.f32 %v217_v27, 0.0 }
 0x196   :  { %v276_v29 = vpop.eup %275 }
 0x197   :  { %v222_v30 = vmul.f32 %v276_v29, %v218_v28  ;;  %v278_v37 = vpop.eup %277 }
 0x199   :  { %v224_v31 = vsel %vm223_vm2, %v222_v30, 0.0 }
 0x19a   :  { %225 = vadd.xlane.f32.xlu0 %v224_v31 }
 0x223   :  { %v226_v35 = vpop.xlane.xlu0 %225 }
 0x224   :  { %v227_v36 = vadd.f32 %v226_v35, %v219_v34 }
 0x226   :  { %229 = vst.msk [vmem:[#allocation2] sm:$0xff] %vm74_vm0, %v227_v36 }
 0x22d   :  { %v236_v38 = vld [vmem:[#allocation2] sm:$0xff] }
 0x22e   :  { %v239_v39 = vadd.f32 %v278_v37, %v236_v38 }
 0x230   :  { %279 = vlog2.f32 %v239_v39 }
 0x23d   :  { %v280_v40 = vpop.eup %279 }
 0x23e   :  { %v241_v41 = vmul.f32 0.6931472, %v280_v40 }
 0x240   :  { %v242_v42 = vsub.f32 %v235_v32, %v241_v41 }
 0x242   :  { %243 = vst.msk [vmem:[%s388_s3] sm:$0xff] %vm74_vm0, %v242_v42 }
 0x243   :  { %248 = vsyncpa [#allocation4], 1 }
 0x244   :  { %249 = vsyncpa [#allocation6], 1 }

</bundles_post_ra>
